<compile_context>
chip_gen: v6e
topology: v6e:2x2x1
jax: 0.10.0
libtpu: 0.0.40
codegen_flags: <defaults>
</compile_context>

<pallas_src>
import jax
import jax.numpy as jnp
from jax.experimental import pallas as pl
from jax.experimental.pallas import tpu as pltpu


def _pmish_kernel(x_ref, ea_ref, o_ref):
    x = x_ref[...].astype(jnp.float32)      # (block_rows, W)
    ea = ea_ref[...]                        # (1, W) f32 = exp(alpha), broadcasts over rows
    z = ea * x
    # tanh(softplus(z)) == n / (n + 2) with n = t^2 + 2t, t = exp(z).
    # Clamp z so t and t^2 stay finite in f32; for z >= 20 the value is 1.0
    # to f32 precision, which the clamped formula reproduces.
    t = jnp.exp(jnp.minimum(z, 20.0))
    n = t * (t + 2.0)
    o_ref[...] = (x * (n / (n + 2.0))).astype(o_ref.dtype)


def parametric_mish(x, alpha, *, block_rows=4096):
    """y = x * tanh(softplus(exp(alpha) * x)).  x: [..., H], alpha: [H]."""
    orig_shape = x.shape
    H = orig_shape[-1]
    out_dtype = x.dtype

    # Hoist exp(alpha) out of the kernel; compute it in f32 for precision.
    exp_alpha = jnp.exp(alpha.astype(jnp.float32))

    x2 = x.reshape(-1, H)
    R = x2.shape[0]

    # Fold rows into the lane axis so the last dim is a multiple of 128.
    if H % 128 == 0:
        fold = 1
    elif 128 % H == 0:
        fold = 128 // H
    else:
        fold = 1  # TODO(synk): hidden sizes not dividing/divided by 128 run with a masked lane axis.
    W = H * fold

    # Pad rows so the folded row count is a multiple of 8 (clean sublane tiling).
    pad_rows = (-R) % (fold * 8)
    if pad_rows:
        x2 = jnp.pad(x2, ((0, pad_rows), (0, 0)))
    Rf = x2.shape[0] // fold
    xf = x2.reshape(Rf, W)

    # Folded alpha: each folded row is `fold` original rows concatenated on lanes.
    ea = jnp.tile(exp_alpha, fold).reshape(1, W)

    # Block rows: as large as requested (multiple of 8), capped at the array.
    if Rf <= block_rows:
        br = Rf
    else:
        br = max(8, (block_rows // 8) * 8)
    grid = (pl.cdiv(Rf, br),)

    out = pl.pallas_call(
        _pmish_kernel,
        out_shape=jax.ShapeDtypeStruct((Rf, W), out_dtype),
        grid_spec=pltpu.PrefetchScalarGridSpec(
            num_scalar_prefetch=0,
            grid=grid,
            in_specs=[
                pl.BlockSpec((br, W), lambda i: (i, 0)),
                pl.BlockSpec((1, W), lambda i: (0, 0)),
            ],
            out_specs=pl.BlockSpec((br, W), lambda i: (i, 0)),
        ),
        compiler_params=pltpu.CompilerParams(
            dimension_semantics=("parallel",)),
    )(xf, ea)

    out = out.reshape(Rf * fold, H)
    if pad_rows:
        out = out[:R]
    return out.reshape(orig_shape)


if __name__ == "__main__":
    # Module config: act_shape = hidden = 32 (alpha initialized to zeros,
    # exactly as nn.Parameter(torch.zeros(hidden))).
    batch, seq, hidden = 2, 8, 32
    key = jax.random.PRNGKey(0)
    x = jax.random.normal(key, (batch, seq, hidden), dtype=jnp.float32)
    alpha = jnp.zeros((hidden,), dtype=jnp.float32)

    y = parametric_mish(x, alpha)
    y = jax.block_until_ready(y)

    # Reference check in plain JAX (original formulation).
    z = jnp.exp(alpha) * x
    ref = x * jnp.tanh(jax.nn.softplus(z))
    assert jnp.allclose(y, ref, atol=1e-5, rtol=1e-5), "mismatch vs reference"

    print("KERNEL_OK")
</pallas_src>

<mosaic_0001>
module attributes {stable_mosaic.version = 11 : i64} {
  func.func @_pmish_kernel(%arg0: i32, %arg1: memref<8x128xf32, #tpu.memory_space<vmem>>, %arg2: memref<1x128xf32, #tpu.memory_space<vmem>>, %arg3: memref<8x128xf32, #tpu.memory_space<vmem>>) attributes {dimension_semantics = [#tpu.dimension_semantics<parallel>], iteration_bounds = array<i64: 1>, scalar_prefetch = 0 : i64, scratch_operands = 0 : i64, tpu.core_type = #tpu.core_type<tc>, window_params = [{transform_indices = @transform_0, window_bounds = array<i64: 8, 128>}, {pipeline_mode = #tpu.pipeline_mode<synchronous>, transform_indices = @transform_1, window_bounds = array<i64: 1, 128>}, {transform_indices = @transform_2, window_bounds = array<i64: 8, 128>}]} {
    %c0 = arith.constant 0 : index
    %c0_0 = arith.constant 0 : index
    %0 = vector.load %arg1[%c0, %c0_0] : memref<8x128xf32, #tpu.memory_space<vmem>>, vector<8x128xf32>
    %c0_1 = arith.constant 0 : index
    %c0_2 = arith.constant 0 : index
    %1 = vector.load %arg2[%c0_1, %c0_2] : memref<1x128xf32, #tpu.memory_space<vmem>>, vector<1x128xf32>
    %2 = vector.broadcast %1 : vector<1x128xf32> to vector<8x128xf32>
    %3 = arith.mulf %2, %0 : vector<8x128xf32>
    %cst = arith.constant 2.000000e+01 : f32
    %4 = vector.broadcast %cst : f32 to vector<8x128xf32>
    %5 = arith.minimumf %3, %4 : vector<8x128xf32>
    %6 = math.exp %5 : vector<8x128xf32>
    %cst_3 = arith.constant 2.000000e+00 : f32
    %7 = vector.broadcast %cst_3 : f32 to vector<8x128xf32>
    %8 = arith.addf %6, %7 : vector<8x128xf32>
    %9 = arith.mulf %6, %8 : vector<8x128xf32>
    %cst_4 = arith.constant 2.000000e+00 : f32
    %10 = vector.broadcast %cst_4 : f32 to vector<8x128xf32>
    %11 = arith.addf %9, %10 : vector<8x128xf32>
    %12 = arith.divf %9, %11 : vector<8x128xf32>
    %13 = arith.mulf %0, %12 : vector<8x128xf32>
    %c0_5 = arith.constant 0 : index
    %c0_6 = arith.constant 0 : index
    %14 = vector.load %arg3[%c0_5, %c0_6] : memref<8x128xf32, #tpu.memory_space<vmem>>, vector<8x128xf32>
    tpu.vector_store %arg3[%c0_5, %c0_6], %13 {strides = array<i32>} : memref<8x128xf32, #tpu.memory_space<vmem>>, vector<8x128xf32>,
    return
  }
  func.func @transform_0(%arg0: i32) -> (i32, i32) {
    %c0_i32 = arith.constant 0 : i32
    %c0_i32_0 = arith.constant 0 : i32
    return %arg0, %c0_i32 : i32, i32
  }
  func.func @transform_1(%arg0: i32) -> (i32, i32) {
    %c0_i32 = arith.constant 0 : i32
    %c0_i32_0 = arith.constant 0 : i32
    %c0_i32_1 = arith.constant 0 : i32
    return %c0_i32, %c0_i32_0 : i32, i32
  }
  func.func @transform_2(%arg0: i32) -> (i32, i32) {
    %c0_i32 = arith.constant 0 : i32
    %c0_i32_0 = arith.constant 0 : i32
    return %arg0, %c0_i32 : i32, i32
  }
}

</mosaic_0001>

<bundles_post_ra>
// kernel: tpu_custom_call.1
= control target key start
LH: loop header
LB: loop body
LE: loop exit
PB: predicated region body
PF: predicated region fallthrough
CT: control target
= control target key end

     0   :  { %7 = vsyncpa [#allocation3], 0  ;;  %s135_s0 = inlined_call_operand.hbm [shape: f32[8,128], index: 0, kind: input, shape index: {}]   ;;  %s136_s1 = inlined_call_operand.vmem [shape: f32[1,128], index: 1, kind: input, shape index: {}]   ;;  %s137_s2 = inlined_call_operand.hbm [shape: f32[8,128], index: 2, kind: output, shape index: {}]  }
   0x1   :  { %8 = vsyncpa [#allocation4], 0  ;;  %s109_s9 = smov [#allocation2]  }
   0x2   :  { %s15_s10 = sshll.u32 %s109_s9, 4  ;;  %s16_s10 = int_to_ptr.vmem [resolvable:$true] %s15_s10 }
   0x3   :  { %s73_s11 = scalar_lea.vmem %s16_s10, 128  ;;  %p78_p1 = scmp.lt.s32.totalorder %s16_s10, %s16_s10 }
   0x4   :  { %p74_p0 = scmp.ne.s32.totalorder %s16_s10, %s73_s11  ;;  %p79_p2 = scmp.lt.s32.totalorder %s73_s11, %s73_s11 }
   0x6   :  { %p80_p3 = por %p79_p2, %p78_p1 }
   0x8   :  { %p81_p4 = pnand %p80_p3, %p74_p0 }
   0xa   :  { %84 = shalt.err (!%p81_p4)
}
   0xb   :  { %18 = dma.hbm_to_vmem [thread:$0]  %s135_s0, 128, %s16_s10, [#allocation3]  }
   0xc   :  { %105 = dma.done.wait [#allocation3], 128  }
   0xd   :  { %106 = vsyncadd [#allocation3], 4294967168  ;;  %v24_v0 = vld [vmem:[#allocation2] sm:$0xff]  ;;  %s110_s16 = smov [#allocation5]  }
   0xe   :  { %v58_v1 = vld [vmem:[%s136_s1] ss:$0 sm:$0xff]  ;;  %s49_s17 = sshll.u32 %s110_s16, 4  ;;  %s50_s17 = int_to_ptr.vmem [resolvable:$true] %s49_s17 }
   0xf   :  { %v32_v2 = vmul.f32 %v58_v1, %v24_v0  ;;  %s85_s0 = scalar_lea.vmem %s50_s17, 128  ;;  %p90_p6 = scmp.lt.s32.totalorder %s50_s17, %s50_s17 }
  0x10   :  { %p86_p5 = scmp.ne.s32.totalorder %s50_s17, %s85_s0  ;;  %p91_p7 = scmp.lt.s32.totalorder %s85_s0, %s85_s0 }
  0x11   :  { %v33_v3 = vmin.f32 %v32_v2, 20.0 }
  0x12   :  { %p92_p8 = por %p91_p7, %p90_p6 }
  0x13   :  { %v34_v4 = vmul.f32 1.442695, %v33_v3 }
  0x14   :  { %p93_p9 = pnand %p92_p8, %p86_p5 }
  0x15   :  { %61 = vpow2.f32 %v34_v4 }
  0x22   :  { %v62_v5 = vpop.eup %61 }
  0x23   :  { %v36_v6 = vadd.f32 2.0, %v62_v5 }
  0x25   :  { %v37_v7 = vmul.f32 %v62_v5, %v36_v6 }
  0x27   :  { %v38_v8 = vadd.f32 2.0, %v37_v7 }
  0x29   :  { %63 = vrcp.f32 %v38_v8 }
  0x36   :  { %v64_v9 = vpop.eup %63 }
  0x37   :  { %v40_v10 = vmul.f32 %v64_v9, %v37_v7 }
  0x39   :  { %v41_v11 = vmul.f32 %v40_v10, %v24_v0 }
  0x3b   :  { %42 = vst [vmem:[#allocation5] sm:$0xff] %v41_v11 }
  0x3c   :  { %96 = shalt.err (!%p93_p9)
}
  0x3d   :  { %52 = dma.vmem_to_hbm [thread:$0]  %s50_s17, 128, %s137_s2, [#allocation4]  }
  0x3e   :  { %107 = dma.done.wait [#allocation4], 128  }
  0x3f   :  { %108 = vsyncadd [#allocation4], 4294967168 }
  0x40   :  { %56 = vsyncpa [#allocation3], 1 }
  0x41   :  { %57 = vsyncpa [#allocation4], 1 }

</bundles_post_ra>
